<compile_context>
chip_gen: v7x
topology: tpu7x:2x2x1
jax: 0.10.0
libtpu: 0.0.40
codegen_flags: <defaults>
</compile_context>

<pallas_src>
import functools

import jax
import jax.numpy as jnp
from jax import lax
from jax.experimental import pallas as pl
from jax.experimental.pallas import tpu as pltpu

_LANE = 128
_ROW_TILE_MAX = 1024  # rows per grid step (multiple of 8); ~512 KiB f32 / input tile


def _pow(x, g):
    gi = int(round(float(g)))
    if float(g) == float(gi) and gi >= 0:
        return lax.integer_pow(x, gi)  # gamma=2 -> x*x (exact, no exp/log on EUP)
    return x ** jnp.float32(g)


def _focal_sum_kernel(p_ref, t_ref, out_ref, acc_ref, *,
                      gamma, alpha, n_valid, row_tile):
    c = pl.program_id(0)        # "parallel" split (maps to 2 TCs on v7x)
    i = pl.program_id(1)        # "arbitrary" reduction axis over row tiles
    n_i = pl.num_programs(1)

    @pl.when(i == 0)
    def _():
        acc_ref[...] = jnp.zeros_like(acc_ref)

    p = p_ref[...].astype(jnp.float32)
    t = t_ref[...].astype(jnp.float32)

    pt = jnp.clip(p, 0.001, 0.999)
    one_m_pt = 1.0 - pt
    loss = (-alpha * _pow(one_m_pt, gamma) * t * jnp.log(pt)
            - (1.0 - alpha) * _pow(pt, gamma) * (1.0 - t) * jnp.log(one_m_pt))

    # In-kernel tail mask (no HBM mask stream): global flat element index of this
    # tile vs. true element count (n_valid is a static Python int; fits int32 for
    # all practically sized inputs).
    tile_start = (c * n_i + i) * (row_tile * _LANE)
    row_idx = lax.broadcasted_iota(jnp.int32, loss.shape, 0)
    lane_idx = lax.broadcasted_iota(jnp.int32, loss.shape, 1)
    flat_idx = tile_start + row_idx * _LANE + lane_idx
    loss = jnp.where(flat_idx < n_valid, loss, 0.0)

    # Vector-shaped accumulation per step (VPU only); defer the cross-lane reduce.
    acc_ref[...] += loss

    @pl.when(i == n_i - 1)
    def _():
        out_ref[0, 0] = jnp.sum(acc_ref[...])


def bce_focal_loss(predict, target, gamma=2.0, alpha=0.25, reduction="mean"):
    assert predict.shape == target.shape
    if reduction not in ("mean", "sum"):
        # TODO(synk): reduction='none' (full per-element loss map) not implemented;
        # the module default is 'mean'.
        raise NotImplementedError("only 'mean' and 'sum' reductions supported")

    n_valid = int(predict.size)

    # Flatten + pad to a lane-dense (total_rows, 128) slab where total_rows is a
    # multiple of row_tile * n_split.
    rows = pl.cdiv(n_valid, _LANE)
    rows8 = pl.cdiv(rows, 8) * 8
    row_tile = min(_ROW_TILE_MAX, rows8)
    tiles = pl.cdiv(rows8, row_tile)
    n_split = 2 if tiles >= 2 else 1            # leading "parallel" axis
    tiles = pl.cdiv(tiles, n_split) * n_split
    tiles_per_split = tiles // n_split
    total_rows = tiles * row_tile
    pad = total_rows * _LANE - n_valid

    p2 = jnp.pad(jnp.ravel(predict), (0, pad)).reshape(total_rows, _LANE)
    t2 = jnp.pad(jnp.ravel(target), (0, pad)).reshape(total_rows, _LANE)

    tile_spec = pl.BlockSpec((row_tile, _LANE),
                             lambda c, i, T=tiles_per_split: (c * T + i, 0))

    kernel = functools.partial(_focal_sum_kernel,
                               gamma=float(gamma), alpha=float(alpha),
                               n_valid=n_valid, row_tile=row_tile)

    partials = pl.pallas_call(
        kernel,
        out_shape=jax.ShapeDtypeStruct((n_split, 1), jnp.float32),
        grid_spec=pltpu.PrefetchScalarGridSpec(
            num_scalar_prefetch=0,
            grid=(n_split, tiles_per_split),
            in_specs=[tile_spec, tile_spec],
            out_specs=pl.BlockSpec((1, 1), lambda c, i: (c, 0),
                                   memory_space=pltpu.SMEM),
            scratch_shapes=[pltpu.VMEM((row_tile, _LANE), jnp.float32)],
        ),
        compiler_params=pltpu.CompilerParams(
            dimension_semantics=("parallel", "arbitrary")),
    )(p2, t2)

    loss_sum = jnp.sum(partials)
    if reduction == "mean":
        return loss_sum / jnp.float32(n_valid)
    return loss_sum


def _reference(predict, target, gamma=2.0, alpha=0.25):
    pt = jnp.clip(predict.astype(jnp.float32), 0.001, 0.999)
    t = target.astype(jnp.float32)
    loss = (-alpha * (1 - pt) ** gamma * t * jnp.log(pt)
            - (1 - alpha) * pt ** gamma * (1 - t) * jnp.log(1 - pt))
    return jnp.mean(loss)


if __name__ == "__main__":
    key = jax.random.PRNGKey(0)

    # Primary shape: NCHW-like per-pixel binary predictions.
    k1, k2, k3, k4 = jax.random.split(key, 4)
    shape = (2, 4, 16, 16)
    predict = jax.nn.sigmoid(jax.random.normal(k1, shape, jnp.float32))
    target = (jax.random.uniform(k2, shape) > 0.5).astype(jnp.float32)

    out = jax.block_until_ready(bce_focal_loss(predict, target))
    ref = _reference(predict, target)
    assert jnp.allclose(out, ref, rtol=1e-5, atol=1e-6), (out, ref)

    # Odd shape: exercises padding + in-kernel tail mask.
    shape2 = (2, 3, 17, 19)
    predict2 = jax.nn.sigmoid(jax.random.normal(k3, shape2, jnp.float32))
    target2 = (jax.random.uniform(k4, shape2) > 0.5).astype(jnp.float32)

    out2 = jax.block_until_ready(bce_focal_loss(predict2, target2))
    ref2 = _reference(predict2, target2)
    assert jnp.allclose(out2, ref2, rtol=1e-5, atol=1e-6), (out2, ref2)

    print("KERNEL_OK")
</pallas_src>

<mosaic_0001>
module attributes {stable_mosaic.version = 11 : i64} {
  func.func @_focal_sum_kernel(%arg0: i32, %arg1: i32, %arg2: memref<16x128xf32, #tpu.memory_space<vmem>>, %arg3: memref<16x128xf32, #tpu.memory_space<vmem>>, %arg4: memref<1x1xf32, #tpu.memory_space<smem>>, %arg5: memref<16x128xf32, #tpu.memory_space<vmem>>) attributes {dimension_semantics = [#tpu.dimension_semantics<parallel>, #tpu.dimension_semantics<arbitrary>], iteration_bounds = array<i64: 1, 1>, scalar_prefetch = 0 : i64, scratch_operands = 1 : i64, tpu.core_type = #tpu.core_type<tc>, window_params = [{transform_indices = @transform_0, window_bounds = array<i64: 16, 128>}, {transform_indices = @transform_1, window_bounds = array<i64: 16, 128>}, {transform_indices = @transform_2, window_bounds = array<i64: 1, 1>}]} {
    %c0_i32 = arith.constant 0 : i32
    %0 = arith.cmpi eq, %arg1, %c0_i32 : i32
    %1 = arith.extui %0 : i1 to i32
    %c0_i32_0 = arith.constant 0 : i32
    %2 = arith.cmpi ne, %1, %c0_i32_0 : i32
    scf.if %2 {
      %cst_17 = arith.constant 0.000000e+00 : f32
      %46 = vector.broadcast %cst_17 : f32 to vector<16x128xf32>
      %c0_18 = arith.constant 0 : index
      %c0_19 = arith.constant 0 : index
      %47 = vector.load %arg5[%c0_18, %c0_19] : memref<16x128xf32, #tpu.memory_space<vmem>>, vector<16x128xf32>
      tpu.vector_store %arg5[%c0_18, %c0_19], %46 {strides = array<i32>} : memref<16x128xf32, #tpu.memory_space<vmem>>, vector<16x128xf32>,
    } else {
    }
    %c0 = arith.constant 0 : index
    %c0_1 = arith.constant 0 : index
    %3 = vector.load %arg2[%c0, %c0_1] : memref<16x128xf32, #tpu.memory_space<vmem>>, vector<16x128xf32>
    %c0_2 = arith.constant 0 : index
    %c0_3 = arith.constant 0 : index
    %4 = vector.load %arg3[%c0_2, %c0_3] : memref<16x128xf32, #tpu.memory_space<vmem>>, vector<16x128xf32>
    %cst = arith.constant 1.000000e-03 : f32
    %cst_4 = arith.constant 9.990000e-01 : f32
    %5 = vector.broadcast %cst : f32 to vector<16x128xf32>
    %6 = arith.maximumf %5, %3 : vector<16x128xf32>
    %7 = vector.broadcast %cst_4 : f32 to vector<16x128xf32>
    %8 = arith.minimumf %7, %6 : vector<16x128xf32>
    %cst_5 = arith.constant 1.000000e+00 : f32
    %9 = vector.broadcast %cst_5 : f32 to vector<16x128xf32>
    %10 = arith.subf %9, %8 : vector<16x128xf32>
    %11 = arith.mulf %10, %10 : vector<16x128xf32>
    %cst_6 = arith.constant -2.500000e-01 : f32
    %12 = vector.broadcast %cst_6 : f32 to vector<16x128xf32>
    %13 = arith.mulf %12, %11 : vector<16x128xf32>
    %14 = arith.mulf %13, %4 : vector<16x128xf32>
    %15 = math.log %8 : vector<16x128xf32>
    %16 = arith.mulf %14, %15 : vector<16x128xf32>
    %17 = arith.mulf %8, %8 : vector<16x128xf32>
    %cst_7 = arith.constant 7.500000e-01 : f32
    %18 = vector.broadcast %cst_7 : f32 to vector<16x128xf32>
    %19 = arith.mulf %18, %17 : vector<16x128xf32>
    %cst_8 = arith.constant 1.000000e+00 : f32
    %20 = vector.broadcast %cst_8 : f32 to vector<16x128xf32>
    %21 = arith.subf %20, %4 : vector<16x128xf32>
    %22 = arith.mulf %19, %21 : vector<16x128xf32>
    %23 = math.log %10 : vector<16x128xf32>
    %24 = arith.mulf %22, %23 : vector<16x128xf32>
    %25 = arith.subf %16, %24 : vector<16x128xf32>
    %c1_i32 = arith.constant 1 : i32
    %26 = arith.muli %arg0, %c1_i32 : i32
    %27 = arith.addi %26, %arg1 : i32
    %c2048_i32 = arith.constant 2048 : i32
    %28 = arith.muli %27, %c2048_i32 : i32
    %29 = tpu.iota {dimensions = array<i32: 0>} : vector<16x128xi32>
    %30 = tpu.iota {dimensions = array<i32: 1>} : vector<16x128xi32>
    %c128_i32 = arith.constant 128 : i32
    %31 = vector.broadcast %c128_i32 : i32 to vector<16x128xi32>
    %32 = arith.muli %29, %31 : vector<16x128xi32>
    %33 = vector.broadcast %28 : i32 to vector<16x128xi32>
    %34 = arith.addi %33, %32 : vector<16x128xi32>
    %35 = arith.addi %34, %30 : vector<16x128xi32>
    %c2048_i32_9 = arith.constant 2048 : i32
    %36 = vector.broadcast %c2048_i32_9 : i32 to vector<16x128xi32>
    %37 = arith.cmpi slt, %35, %36 : vector<16x128xi32>
    %cst_10 = arith.constant 0.000000e+00 : f32
    %38 = vector.broadcast %cst_10 : f32 to vector<16x128xf32>
    %39 = arith.select %37, %25, %38 : vector<16x128xi1>, vector<16x128xf32>
    %c0_11 = arith.constant 0 : index
    %c0_12 = arith.constant 0 : index
    %40 = vector.load %arg5[%c0_11, %c0_12] : memref<16x128xf32, #tpu.memory_space<vmem>>, vector<16x128xf32>
    %41 = arith.addf %40, %39 : vector<16x128xf32>
    %c0_13 = arith.constant 0 : index
    %c0_14 = arith.constant 0 : index
    %42 = vector.load %arg5[%c0_13, %c0_14] : memref<16x128xf32, #tpu.memory_space<vmem>>, vector<16x128xf32>
    tpu.vector_store %arg5[%c0_13, %c0_14], %41 {strides = array<i32>} : memref<16x128xf32, #tpu.memory_space<vmem>>, vector<16x128xf32>,
    %c0_i32_15 = arith.constant 0 : i32
    %43 = arith.cmpi eq, %arg1, %c0_i32_15 : i32
    %44 = arith.extui %43 : i1 to i32
    %c0_i32_16 = arith.constant 0 : i32
    %45 = arith.cmpi ne, %44, %c0_i32_16 : i32
    scf.if %45 {
      %c0_17 = arith.constant 0 : index
      %c0_18 = arith.constant 0 : index
      %46 = vector.load %arg5[%c0_17, %c0_18] : memref<16x128xf32, #tpu.memory_space<vmem>>, vector<16x128xf32>
      %47 = vector.shape_cast %46 : vector<16x128xf32> to vector<1x16x128xf32>
      %cst_19 = arith.constant dense<0.000000e+00> : vector<1xf32>
      %48 = vector.multi_reduction <add>, %47, %cst_19 [1, 2] : vector<1x16x128xf32> to vector<1xf32>
      %49 = vector.shape_cast %48 : vector<1xf32> to vector<1x1x1xf32>
      %50 = vector.extract %49[0, 0, 0] : f32 from vector<1x1x1xf32>
      %c0_20 = arith.constant 0 : index
      %c0_21 = arith.constant 0 : index
      %51 = memref.load %arg4[%c0_20, %c0_21] : memref<1x1xf32, #tpu.memory_space<smem>>
      memref.store %50, %arg4[%c0_20, %c0_21] : memref<1x1xf32, #tpu.memory_space<smem>>
    } else {
    }
    return
  }
  func.func @transform_0(%arg0: i32, %arg1: i32) -> (i32, i32) {
    %c1_i32 = arith.constant 1 : i32
    %0 = arith.muli %arg0, %c1_i32 : i32
    %1 = arith.addi %0, %arg1 : i32
    %c0_i32 = arith.constant 0 : i32
    %c0_i32_0 = arith.constant 0 : i32
    return %1, %c0_i32 : i32, i32
  }
  func.func @transform_1(%arg0: i32, %arg1: i32) -> (i32, i32) {
    %c1_i32 = arith.constant 1 : i32
    %0 = arith.muli %arg0, %c1_i32 : i32
    %1 = arith.addi %0, %arg1 : i32
    %c0_i32 = arith.constant 0 : i32
    %c0_i32_0 = arith.constant 0 : i32
    return %1, %c0_i32 : i32, i32
  }
  func.func @transform_2(%arg0: i32, %arg1: i32) -> (i32, i32) {
    %c0_i32 = arith.constant 0 : i32
    %c0_i32_0 = arith.constant 0 : i32
    return %arg0, %c0_i32 : i32, i32
  }
}

</mosaic_0001>

<bundles_post_ra>
// kernel: tpu_custom_call.1
= control target key start
LH: loop header
LB: loop body
LE: loop exit
PB: predicated region body
PF: predicated region fallthrough
CT: control target
= control target key end

     0   :  { %7 = vsyncpa [#allocation4], 0  ;;  %s283_s0 = inlined_call_operand.hbm [shape: f32[16,128], index: 0, kind: input, shape index: {}]   ;;  %s284_s1 = inlined_call_operand.hbm [shape: f32[16,128], index: 1, kind: input, shape index: {}]   ;;  %s285_s2 = inlined_call_operand.hbm [shape: f32[1,1], index: 2, kind: output, shape index: {}]  }
   0x1   :  { %8 = vsyncpa [#allocation7], 0 }
   0x2   :  { %9 = vsyncpa [#allocation5], 0  ;;  %s227_s9 = smov [#allocation3]   ;;  %s167_s13 = scalar_lea.hbm %s283_s0, 256 }
   0x3   :  { %s19_s10 = sshll.u32 %s227_s9, 4  ;;  %p168_p0 = scmp.ne.s32.totalorder %s283_s0, %s167_s13  ;;  %s20_s10 = int_to_ptr.vmem [resolvable:$true] %s19_s10 }
   0x4   :  { %p171_p1 = scmp.lt.u32.totalorder %s167_s13, %s283_s0 }
   0x6   :  { %p173_p2 = pnand %p171_p1, %p168_p0 }
   0x8   :  { %176 = shalt.err (!%p173_p2)
}
   0x9   :  { %s177_s18 = scalar_lea.vmem %s20_s10, 256  ;;  %p182_p4 = scmp.lt.s32.totalorder %s20_s10, %s20_s10 }
   0xa   :  { %p178_p3 = scmp.ne.s32.totalorder %s20_s10, %s177_s18  ;;  %p183_p5 = scmp.lt.s32.totalorder %s177_s18, %s177_s18 }
   0xc   :  { %p184_p6 = por %p183_p5, %p182_p4 }
   0xe   :  { %p185_p7 = pnand %p184_p6, %p178_p3 }
  0x10   :  { %188 = shalt.err (!%p185_p7)
}
  0x11   :  { %s228_s19 = smov 128   ;;  %s229_s20 = smov 8  }
  0x12   :  { %25 = dma.hbm_to_vmem [thread:$0]  %s283_s0, 256, %s20_s10, [#allocation4], %s228_s19, %s228_s19, %s229_s20  }
  0x13   :  { %s230_s23 = smov [#allocation6]   ;;  %s189_s27 = scalar_lea.hbm %s284_s1, 256 }
  0x14   :  { %s35_s24 = sshll.u32 %s230_s23, 4  ;;  %p190_p8 = scmp.ne.s32.totalorder %s284_s1, %s189_s27  ;;  %s36_s24 = int_to_ptr.vmem [resolvable:$true] %s35_s24 }
  0x15   :  { %p193_p9 = scmp.lt.u32.totalorder %s189_s27, %s284_s1 }
  0x17   :  { %p195_p10 = pnand %p193_p9, %p190_p8 }
  0x19   :  { %198 = shalt.err (!%p195_p10)
}
  0x1a   :  { %s199_s4 = scalar_lea.vmem %s36_s24, 256  ;;  %p204_p12 = scmp.lt.s32.totalorder %s36_s24, %s36_s24 }
  0x1b   :  { %p200_p11 = scmp.ne.s32.totalorder %s36_s24, %s199_s4  ;;  %p205_p13 = scmp.lt.s32.totalorder %s199_s4, %s199_s4 }
  0x1d   :  { %p206_p0 = por %p205_p13, %p204_p12 }
  0x1f   :  { %p207_p1 = pnand %p206_p0, %p200_p11 }
  0x21   :  { %210 = shalt.err (!%p207_p1)
}
  0x22   :  { %41 = dma.hbm_to_vmem [thread:$0]  %s284_s1, 256, %s36_s24, [#allocation7], %s228_s19, %s228_s19, %s229_s20  }
  0x23   :  { %221 = dma.done.wait [#allocation4], 256  }
  0x24   :  { %222 = vsyncadd [#allocation4], 4294967040 }
  0x25   :  { %223 = dma.done.wait [#allocation7], 256  }
  0x26   :  { %224 = vsyncadd [#allocation7], 4294967040  ;;  %v58_v0 = vld [vmem:[#allocation3] sm:$0xff]  ;;  %v59_v1 = vld [vmem:[#allocation3 + $0x8] sm:$0xff]  ;;  %v98_v4 = vlaneseq  ;;  %s211_s8 = scalar_lea.hbm %s285_s2, 16 }
  0x27   :  { %v62_v2 = vmax.f32 %v58_v0, 0.001  ;;  %v63_v3 = vmax.f32 %v59_v1, 0.001  ;;  %v60_v13 = vld [vmem:[#allocation6] sm:$0xff]  ;;  %v61_v15 = vld [vmem:[#allocation6 + $0x8] sm:$0xff]  ;;  %p212_p2 = scmp.ne.s32.totalorder %s285_s2, %s211_s8  ;;  %p215_p3 = scmp.lt.u32.totalorder %s211_s8, %s285_s2 }
  0x28   :  { %v99_v9 = vshrl.u32 %v98_v4, 7  ;;  %v84_v20 = vsub.f32 1.0, %v60_v13  ;;  %v85_v22 = vsub.f32 1.0, %v61_v15  ;;  %v102_v23 = vand.u32 127, %v98_v4 }
  0x29   :  { %v64_v5 = vmin.f32 %v62_v2, 0.999  ;;  %v65_v6 = vmin.f32 %v63_v3, 0.999  ;;  %p217_p4 = pnand %p215_p3, %p212_p2 }
  0x2a   :  { %v100_v17 = vadd.s32 8, %v99_v9  ;;  %v103_v24 = vmul.u32 128, %v99_v9 }
  0x2b   :  { %v66_v7 = vsub.f32 1.0, %v64_v5  ;;  %v67_v8 = vsub.f32 1.0, %v65_v6  ;;  %159 = vlog2.f32 %v64_v5  ;;  %v80_v12 = vmul.f32 %v64_v5, %v64_v5 }
  0x2c   :  { %161 = vlog2.f32 %v65_v6  ;;  %v81_v14 = vmul.f32 %v65_v6, %v65_v6  ;;  %v104_v26 = vmul.u32 128, %v100_v17  ;;  %v108_v35 = vadd.s32 %v103_v24, %v102_v23 }
  0x2d   :  { %v68_v10 = vmul.f32 %v66_v7, %v66_v7  ;;  %v69_v11 = vmul.f32 %v67_v8, %v67_v8  ;;  %163 = vlog2.f32 %v66_v7  ;;  %v82_v19 = vmul.f32 0.75, %v80_v12 }
  0x2e   :  { %165 = vlog2.f32 %v67_v8  ;;  %v83_v21 = vmul.f32 0.75, %v81_v14  ;;  %v109_v39 = vadd.s32 %v104_v26, %v102_v23  ;;  %vm110_vm0 = vcmp.lt.s32.totalorder %v108_v35, 2048 }
  0x2f   :  { %v70_v16 = vmul.f32 -0.25, %v68_v10  ;;  %v71_v18 = vmul.f32 -0.25, %v69_v11  ;;  %v86_v31 = vmul.f32 %v84_v20, %v82_v19 }
  0x30   :  { %v87_v34 = vmul.f32 %v85_v22, %v83_v21  ;;  %vm111_vm1 = vcmp.lt.s32.totalorder %v109_v39, 2048 }
  0x31   :  { %v72_v25 = vmul.f32 %v70_v16, %v60_v13  ;;  %v73_v28 = vmul.f32 %v71_v18, %v61_v15 }
  0x35   :  { %v160_v27 = vpop.eup %159 }
  0x36   :  { %v162_v29 = vpop.eup %161  ;;  %v75_v30 = vmul.f32 0.6931472, %v160_v27 }
  0x37   :  { %v164_v32 = vpop.eup %163  ;;  %v77_v33 = vmul.f32 0.6931472, %v162_v29 }
  0x38   :  { %v166_v36 = vpop.eup %165  ;;  %v78_v37 = vmul.f32 %v75_v30, %v72_v25  ;;  %v89_v38 = vmul.f32 0.6931472, %v164_v32 }
  0x39   :  { %v79_v40 = vmul.f32 %v77_v33, %v73_v28  ;;  %v91_v41 = vmul.f32 0.6931472, %v166_v36 }
  0x3a   :  { %v92_v42 = vmul.f32 %v89_v38, %v86_v31 }
  0x3b   :  { %v93_v43 = vmul.f32 %v91_v41, %v87_v34 }
  0x3c   :  { %v94_v44 = vsub.f32 %v78_v37, %v92_v42 }
  0x3d   :  { %v95_v45 = vsub.f32 %v79_v40, %v93_v43 }
  0x3e   :  { %v112_v46 = vsel %vm110_vm0, %v94_v44, 0.0 }
  0x3f   :  { %v113_v47 = vsel %vm111_vm1, %v95_v45, 0.0 }
  0x40   :  { %v125_v48 = vadd.f32 %v113_v47, %v112_v46 }
  0x42   :  { %126 = vadd.xlane.f32.xlu0 %v125_v48 }
  0xcf   :  { %v127_v49 = vpop.xlane.xlu0 %126 }
  0xd0   :  { %v128_v50 = vrot.slane %v127_v49, 4 }
  0xd2   :  { %v129_v51 = vadd.f32 %v128_v50, %v127_v49 }
  0xd4   :  { %v130_v52 = vrot.slane %v129_v51, 2 }
  0xd6   :  { %v131_v53 = vadd.f32 %v130_v52, %v129_v51 }
  0xd8   :  { %v132_v54 = vrot.slane %v131_v53, 1 }
  0xda   :  { %v133_v55 = vadd.f32 %v132_v54, %v131_v53 }
  0xdc   :  { %152 = vpush %v133_v55 }
 0x10d   :  { %s153_s1 = spop %152 }
 0x10e   :  { %136 = sst [smem:[#allocation8]] %s153_s1 }
 0x10f   :  { %220 = shalt.err (!%p217_p4)
}
 0x110   :  { %s231_s13 = smov [#allocation8]  }
 0x111   :  { %144 = dma.smem_to_hbm %s231_s13, 16, %s285_s2, [#allocation5]  }
 0x112   :  { %225 = dma.done.wait [#allocation5], 16  }
 0x113   :  { %226 = vsyncadd [#allocation5], 4294967280 }
 0x114   :  { %148 = sfence }
 0x115   :  { %149 = vsyncpa [#allocation4], 1 }
 0x116   :  { %150 = vsyncpa [#allocation7], 1 }
 0x117   :  { %151 = vsyncpa [#allocation5], 1 }

</bundles_post_ra>
